<compile_context>
chip_gen: v7x
topology: tpu7x:2x2x1
jax: 0.10.0
libtpu: 0.0.40
codegen_flags: <defaults>
</compile_context>

<pallas_src>
import functools
import numpy as np
import jax
import jax.numpy as jnp
from jax import lax
from jax.experimental import pallas as pl
from jax.experimental.pallas import tpu as pltpu

EPS = float(np.finfo(np.float32).eps)
HALO = 4  # halo frames per side of a time tile (delta/delta-delta need 2; 4 keeps rows %8==0)


def _round_up(x, m):
    return ((x + m - 1) // m) * m


# ----------------------------- constants (plain numpy) -----------------------------
def trimf(x, params):
    a, b, c = params
    y = np.zeros_like(x, dtype=np.float32)
    if a < b:
        idx = np.logical_and(a < x, x < b)
        y[idx] = (x[idx] - a) / (b - a)
    if b < c:
        idx = np.logical_and(b < x, x < c)
        y[idx] = (c - x[idx]) / (c - b)
    y[x == b] = 1.0
    return y


def make_raw_constants(fl, fs, fn, sr, filter_num):
    nbin = fn // 2 + 1
    # periodic hamming window (torch.hamming_window default), centered & zero-padded to fn
    n = np.arange(fl)
    win = 0.54 - 0.46 * np.cos(2.0 * np.pi * n / fl)
    lpad = (fn - fl) // 2
    win_p = np.zeros(fn, dtype=np.float32)
    win_p[lpad:lpad + fl] = win

    # one-sided DFT basis: |X[k]|^2 = (x@cos)^2 + (x@sin)^2
    nn_ = np.arange(fn)[:, None]
    kk = np.arange(nbin)[None, :]
    ang = 2.0 * np.pi * nn_ * kk / fn
    cos_m = np.cos(ang).astype(np.float32)
    sin_m = np.sin(ang).astype(np.float32)

    # linear-frequency triangular filter bank (nbin, filter_num)
    f = sr / 2.0 * np.linspace(0.0, 1.0, nbin)
    bands = np.linspace(f.min(), f.max(), filter_num + 2)
    fbank = np.zeros((nbin, filter_num), dtype=np.float32)
    for i in range(filter_num):
        fbank[:, i] = trimf(f, [bands[i], bands[i + 1], bands[i + 2]])

    # ortho DCT-II as a right-multiplied matrix: y = x @ dct_m == dct(x, norm='ortho')
    N = filter_num
    kx = np.arange(N)[:, None]
    nx = np.arange(N)[None, :]
    C = np.sqrt(2.0 / N) * np.cos(np.pi * (2 * nx + 1) * kx / (2 * N))
    C[0, :] *= 1.0 / np.sqrt(2.0)
    dct_m = C.T.astype(np.float32)

    return win_p, cos_m, sin_m, fbank, dct_m


def make_kernel_constants(fl, fs, fn, sr, filter_num):
    """Window-folded, cos|sin-fused, lane-padded constant matrices."""
    win, cos_m, sin_m, fbank, dct_m = make_raw_constants(fl, fs, fn, sr, filter_num)
    nbin = fn // 2 + 1
    nbin_p = _round_up(nbin, 128)
    filt_p = _round_up(filter_num, 128)

    cs = np.zeros((fn, 2 * nbin_p), dtype=np.float32)
    cs[:, :nbin] = win[:, None] * cos_m                       # window folded in
    cs[:, nbin_p:nbin_p + nbin] = win[:, None] * sin_m        # cos|sin fused, lane padded

    fb_p = np.zeros((nbin_p, filt_p), dtype=np.float32)
    fb_p[:nbin, :filter_num] = fbank                          # padded sp bins are exact zeros

    dct_p = np.zeros((filt_p, filt_p), dtype=np.float32)
    dct_p[:filter_num, :filter_num] = dct_m                   # zero rows -> no padding leakage

    return cs, fb_p, dct_p, nbin_p, filt_p


# ----------------------------------------- Pallas kernel -----------------------------------------
def lfcc_kernel(frames_ref, cs_ref, fb_ref, dct_ref, out_ref, *,
                fn, nbin_p, tf, n_frames, with_energy, with_delta, flag_for_LFB):
    filt_p = fb_ref.shape[1]

    fr = frames_ref[0, 0]                                               # (tf+2H, fn); window is in cs
    reim = jnp.dot(fr, cs_ref[...], preferred_element_type=jnp.float32)  # (tf+2H, 2*nbin_p)
    re = reim[:, :nbin_p]
    im = reim[:, nbin_p:]
    sp = re * re + im * im                                              # |STFT|^2 (padded bins == 0)

    fb_feat = jnp.log10(jnp.dot(sp, fb_ref[...],
                                preferred_element_type=jnp.float32) + EPS)
    if flag_for_LFB:
        lfcc = fb_feat
    else:
        lfcc = jnp.dot(fb_feat, dct_ref[...], preferred_element_type=jnp.float32)

    if with_energy:
        energy = jnp.log10(jnp.sum(sp, axis=1, keepdims=True) / fn + EPS)
        col = lax.broadcasted_iota(jnp.int32, lfcc.shape, 1)
        lfcc = jnp.where(col == 0, energy, lfcc)                        # lane-0 select, no concat

    if not with_delta:
        out_ref[0] = lfcc[HALO:HALO + tf]
        return

    t = pl.program_id(1)
    # delta[g] = L[g+1] - L[g-1] with replicate padding at the true sequence boundaries.
    # d1e[j] = lfcc[j+2] - lfcc[j]  ==  delta at extended row j+1 (global frame t*tf + j + 1 - HALO)
    d1e = lfcc[2:] - lfcc[:-2]
    g = lax.broadcasted_iota(jnp.int32, (d1e.shape[0], 1), 0) + (t * tf + 1 - HALO)
    d1_next = jnp.concatenate([d1e[1:], d1e[-1:]], axis=0)              # [j] -> d1e[j+1]
    d1_prev = jnp.concatenate([d1e[:1], d1e[:-1]], axis=0)              # [j] -> d1e[j-1]
    # replicate padding of delta() at global rows -1 and n_frames (only matter for delta-delta)
    d1e = jnp.where(g == -1, d1_next, jnp.where(g == n_frames, d1_prev, d1e))
    # d2e[m] = d1(ext m+3) - d1(ext m+1) == delta-delta at extended row m+2
    d2e = d1e[2:] - d1e[:-2]

    # three unmasked 128-lane slabs (sliced/reassembled in the wrapper)
    out_ref[0, :, 0:filt_p] = lfcc[HALO:HALO + tf]
    out_ref[0, :, filt_p:2 * filt_p] = d1e[HALO - 1:HALO - 1 + tf]
    out_ref[0, :, 2 * filt_p:3 * filt_p] = d2e[HALO - 2:HALO - 2 + tf]


# ----------------------------------------- wrapper -----------------------------------------
def lfcc_forward(x, *, fl, fs, fn, sr, filter_num,
                 with_energy=False, with_emphasis=True, with_delta=True, flag_for_LFB=False,
                 frame_tile=256, use_bf16=False):
    x = x.astype(jnp.float32)
    B, L = x.shape

    if with_emphasis:
        x = x.at[:, 1:].set(x[:, 1:] - 0.97 * x[:, :-1])

    # torch.stft(center=True, pad_mode='constant') -> zero-pad fn//2 on each side
    pad = fn // 2
    x_pad = jnp.pad(x, ((0, 0), (pad, pad)))
    n_frames = (L + 2 * pad - fn) // fs + 1

    tf = min(frame_tile, _round_up(n_frames, 8))      # time-tile size (multiple of 8)
    n_tiles = -(-n_frames // tf)

    # Overlapping (halo'ed) frame tiles gathered once in the wrapper:
    #   tile t, row r -> frame index clip(t*tf + r - HALO, 0, n_frames-1)  (replicate at edges)
    f_idx = np.arange(n_tiles)[:, None] * tf + np.arange(tf + 2 * HALO)[None, :] - HALO
    f_idx = np.clip(f_idx, 0, n_frames - 1)
    samp = f_idx[:, :, None] * fs + np.arange(fn)[None, None, :]        # (n_tiles, tf+2H, fn)
    frames = x_pad[:, samp]                                             # (B, n_tiles, tf+2H, fn)
    # TODO(synk): for very small fn/fs on mem-bound chips (v5e) the framed array could be
    # avoided entirely by passing x_pad with memory_space=pl.ANY and slicing frames in-kernel.

    cs, fb_p, dct_p, nbin_p, filt_p = make_kernel_constants(fl, fs, fn, sr, filter_num)
    if use_bf16:  # opt-in reduced-precision MXU path (v6e/v7x); default off to keep f32 accuracy
        cs = cs.astype(np.bfloat16)
        frames = frames.astype(jnp.bfloat16)
    cs = jnp.asarray(cs)
    fb_p = jnp.asarray(fb_p)
    dct_p = jnp.asarray(dct_p)

    n_slabs = 3 if with_delta else 1
    out_w = n_slabs * filt_p

    kernel = functools.partial(
        lfcc_kernel, fn=fn, nbin_p=nbin_p, tf=tf, n_frames=n_frames,
        with_energy=with_energy, with_delta=with_delta, flag_for_LFB=flag_for_LFB)

    out = pl.pallas_call(
        kernel,
        out_shape=jax.ShapeDtypeStruct((B, n_tiles * tf, out_w), jnp.float32),
        grid_spec=pltpu.PrefetchScalarGridSpec(
            num_scalar_prefetch=0,
            grid=(B, n_tiles),
            in_specs=[
                pl.BlockSpec((1, 1, tf + 2 * HALO, fn), lambda b, t: (b, t, 0, 0)),
                pl.BlockSpec((fn, 2 * nbin_p), lambda b, t: (0, 0)),
                pl.BlockSpec((nbin_p, filt_p), lambda b, t: (0, 0)),
                pl.BlockSpec((filt_p, filt_p), lambda b, t: (0, 0)),
            ],
            out_specs=pl.BlockSpec((1, tf, out_w), lambda b, t: (b, t, 0)),
        ),
        compiler_params=pltpu.CompilerParams(
            dimension_semantics=("parallel", "parallel")),
    )(frames, cs, fb_p, dct_p)

    out = out.reshape(B, n_tiles * tf, n_slabs, filt_p)[:, :n_frames, :, :filter_num]
    return out.reshape(B, n_frames, n_slabs * filter_num)


# ----------------------------------------- pure-JAX reference -----------------------------------------
def lfcc_reference(x, *, fl, fs, fn, sr, filter_num):
    """Plain-XLA reference for the default flags (emphasis + delta, no energy, no LFB).
    Uses the same constant matrices as the kernel so both sides feed identical operands to
    the MXU (result is independent of the backend's default f32-matmul precision)."""
    x = x.astype(jnp.float32)
    B, L = x.shape
    x = x.at[:, 1:].set(x[:, 1:] - 0.97 * x[:, :-1])
    pad = fn // 2
    x_pad = jnp.pad(x, ((0, 0), (pad, pad)))
    n_frames = (L + 2 * pad - fn) // fs + 1
    idx = np.arange(n_frames)[:, None] * fs + np.arange(fn)[None, :]
    frames = x_pad[:, idx]                                              # (B, F, fn)

    cs, fb_p, dct_p, nbin_p, filt_p = make_kernel_constants(fl, fs, fn, sr, filter_num)
    cs, fb_p, dct_p = jnp.asarray(cs), jnp.asarray(fb_p), jnp.asarray(dct_p)

    reim = jnp.einsum('bfn,nk->bfk', frames, cs)
    re, im = reim[..., :nbin_p], reim[..., nbin_p:]
    sp = re * re + im * im
    fb_feat = jnp.log10(jnp.einsum('bfk,km->bfm', sp, fb_p) + EPS)
    lfcc = jnp.einsum('bfm,mn->bfn', fb_feat, dct_p)[..., :filter_num]

    def delta(v):
        p = jnp.concatenate([v[:, :1], v, v[:, -1:]], axis=1)
        return p[:, 2:] - p[:, :v.shape[1]]

    d1 = delta(lfcc)
    d2 = delta(d1)
    return jnp.concatenate([lfcc, d1, d2], axis=2)


# ----------------------------------------- main -----------------------------------------
if __name__ == "__main__":
    # small, module-consistent config: fl=32, fs=16, fn=32, sr=16000, 20 filters
    fl, fs, fn, sr, filter_num = 32, 16, 32, 16000, 20
    B, L = 2, 256

    key = jax.random.PRNGKey(0)
    x = jax.random.normal(key, (B, L), dtype=jnp.float32)

    out = jax.block_until_ready(
        lfcc_forward(x, fl=fl, fs=fs, fn=fn, sr=sr, filter_num=filter_num))
    ref = jax.block_until_ready(
        lfcc_reference(x, fl=fl, fs=fs, fn=fn, sr=sr, filter_num=filter_num))

    assert out.shape == (B, 1 + L // fs, 3 * filter_num), out.shape
    np.testing.assert_allclose(np.asarray(out), np.asarray(ref), rtol=1e-4, atol=1e-4)

    print("KERNEL_OK")
</pallas_src>

<mosaic_0001>
module attributes {stable_mosaic.version = 11 : i64} {
  func.func @lfcc_kernel(%arg0: i32, %arg1: i32, %arg2: memref<1x1x32x32xf32, #tpu.memory_space<vmem>>, %arg3: memref<32x256xf32, #tpu.memory_space<vmem>>, %arg4: memref<128x128xf32, #tpu.memory_space<vmem>>, %arg5: memref<128x128xf32, #tpu.memory_space<vmem>>, %arg6: memref<1x24x384xf32, #tpu.memory_space<vmem>>) attributes {dimension_semantics = [#tpu.dimension_semantics<parallel>, #tpu.dimension_semantics<parallel>], iteration_bounds = array<i64: 2, 1>, scalar_prefetch = 0 : i64, scratch_operands = 0 : i64, tpu.core_type = #tpu.core_type<tc>, window_params = [{transform_indices = @transform_0, window_bounds = array<i64: 1, 1, 32, 32>}, {pipeline_mode = #tpu.pipeline_mode<synchronous>, transform_indices = @transform_1, window_bounds = array<i64: 32, 256>}, {pipeline_mode = #tpu.pipeline_mode<synchronous>, transform_indices = @transform_2, window_bounds = array<i64: 128, 128>}, {pipeline_mode = #tpu.pipeline_mode<synchronous>, transform_indices = @transform_3, window_bounds = array<i64: 128, 128>}, {transform_indices = @transform_4, window_bounds = array<i64: 1, 24, 384>}]} {
    %c0 = arith.constant 0 : index
    %c0_0 = arith.constant 0 : index
    %c0_1 = arith.constant 0 : index
    %c0_2 = arith.constant 0 : index
    %0 = vector.load %arg2[%c0, %c0_0, %c0_1, %c0_2] : memref<1x1x32x32xf32, #tpu.memory_space<vmem>>, vector<1x1x32x32xf32>
    %1 = vector.shape_cast %0 : vector<1x1x32x32xf32> to vector<32x32xf32>
    %c0_3 = arith.constant 0 : index
    %c0_4 = arith.constant 0 : index
    %2 = vector.load %arg3[%c0_3, %c0_4] : memref<32x256xf32, #tpu.memory_space<vmem>>, vector<32x256xf32>
    %cst = arith.constant dense<0.000000e+00> : vector<32x256xf32>
    %3 = tpu.matmul %1, %2, %cst {dimension_numbers = #tpu.dot_dimension_numbers<[1], [0], [0], [1], [0, 0, 1, 1], [], []>} : vector<32x32xf32>, vector<32x256xf32>, vector<32x256xf32> -> vector<32x256xf32>
    %4 = vector.extract_strided_slice %3 {offsets = [0, 0], sizes = [32, 128], strides = [1, 1]} : vector<32x256xf32> to vector<32x128xf32>
    %5 = vector.extract_strided_slice %3 {offsets = [0, 128], sizes = [32, 128], strides = [1, 1]} : vector<32x256xf32> to vector<32x128xf32>
    %6 = arith.mulf %4, %4 : vector<32x128xf32>
    %7 = arith.mulf %5, %5 : vector<32x128xf32>
    %8 = arith.addf %6, %7 : vector<32x128xf32>
    %c0_5 = arith.constant 0 : index
    %c0_6 = arith.constant 0 : index
    %9 = vector.load %arg4[%c0_5, %c0_6] : memref<128x128xf32, #tpu.memory_space<vmem>>, vector<128x128xf32>
    %cst_7 = arith.constant dense<0.000000e+00> : vector<32x128xf32>
    %10 = tpu.matmul %8, %9, %cst_7 {dimension_numbers = #tpu.dot_dimension_numbers<[1], [0], [0], [1], [0, 0, 1, 1], [], []>} : vector<32x128xf32>, vector<128x128xf32>, vector<32x128xf32> -> vector<32x128xf32>
    %cst_8 = arith.constant 1.1920929E-7 : f32
    %11 = vector.broadcast %cst_8 : f32 to vector<32x128xf32>
    %12 = arith.addf %10, %11 : vector<32x128xf32>
    %13 = math.log %12 : vector<32x128xf32>
    %cst_9 = arith.constant 0.434294492 : f32
    %14 = vector.broadcast %cst_9 : f32 to vector<32x128xf32>
    %15 = arith.mulf %13, %14 : vector<32x128xf32>
    %c0_10 = arith.constant 0 : index
    %c0_11 = arith.constant 0 : index
    %16 = vector.load %arg5[%c0_10, %c0_11] : memref<128x128xf32, #tpu.memory_space<vmem>>, vector<128x128xf32>
    %cst_12 = arith.constant dense<0.000000e+00> : vector<32x128xf32>
    %17 = tpu.matmul %15, %16, %cst_12 {dimension_numbers = #tpu.dot_dimension_numbers<[1], [0], [0], [1], [0, 0, 1, 1], [], []>} : vector<32x128xf32>, vector<128x128xf32>, vector<32x128xf32> -> vector<32x128xf32>
    %18 = vector.extract_strided_slice %17 {offsets = [2, 0], sizes = [30, 128], strides = [1, 1]} : vector<32x128xf32> to vector<30x128xf32>
    %19 = vector.extract_strided_slice %17 {offsets = [0, 0], sizes = [30, 128], strides = [1, 1]} : vector<32x128xf32> to vector<30x128xf32>
    %20 = arith.subf %18, %19 : vector<30x128xf32>
    %21 = tpu.iota {dimensions = array<i32: 0>} : vector<30x1xi32>
    %c24_i32 = arith.constant 24 : i32
    %22 = arith.muli %arg1, %c24_i32 : i32
    %c1_i32 = arith.constant 1 : i32
    %23 = arith.addi %22, %c1_i32 : i32
    %c4_i32 = arith.constant 4 : i32
    %24 = arith.subi %23, %c4_i32 : i32
    %25 = vector.broadcast %24 : i32 to vector<30x1xi32>
    %26 = arith.addi %21, %25 : vector<30x1xi32>
    %27 = vector.extract_strided_slice %20 {offsets = [1, 0], sizes = [29, 128], strides = [1, 1]} : vector<30x128xf32> to vector<29x128xf32>
    %28 = vector.extract_strided_slice %20 {offsets = [29, 0], sizes = [1, 128], strides = [1, 1]} : vector<30x128xf32> to vector<1x128xf32>
    %29 = tpu.concatenate %27, %28 in 0 : vector<29x128xf32>, vector<1x128xf32> -> vector<30x128xf32>
    %30 = vector.extract_strided_slice %20 {offsets = [0, 0], sizes = [1, 128], strides = [1, 1]} : vector<30x128xf32> to vector<1x128xf32>
    %31 = vector.extract_strided_slice %20 {offsets = [0, 0], sizes = [29, 128], strides = [1, 1]} : vector<30x128xf32> to vector<29x128xf32>
    %32 = tpu.concatenate %30, %31 in 0 : vector<1x128xf32>, vector<29x128xf32> -> vector<30x128xf32>
    %c-1_i32 = arith.constant -1 : i32
    %33 = vector.broadcast %c-1_i32 : i32 to vector<30x1xi32>
    %34 = arith.cmpi eq, %26, %33 : vector<30x1xi32>
    %c17_i32 = arith.constant 17 : i32
    %35 = vector.broadcast %c17_i32 : i32 to vector<30x1xi32>
    %36 = arith.cmpi eq, %26, %35 : vector<30x1xi32>
    %37 = vector.shape_cast %36 : vector<30x1xi1> to vector<30x1xi1>
    %38 = vector.broadcast %37 : vector<30x1xi1> to vector<30x128xi1>
    %39 = arith.select %38, %32, %20 : vector<30x128xi1>, vector<30x128xf32>
    %40 = vector.shape_cast %34 : vector<30x1xi1> to vector<30x1xi1>
    %41 = vector.broadcast %40 : vector<30x1xi1> to vector<30x128xi1>
    %42 = arith.select %41, %29, %39 : vector<30x128xi1>, vector<30x128xf32>
    %43 = vector.extract_strided_slice %42 {offsets = [2, 0], sizes = [28, 128], strides = [1, 1]} : vector<30x128xf32> to vector<28x128xf32>
    %44 = vector.extract_strided_slice %42 {offsets = [0, 0], sizes = [28, 128], strides = [1, 1]} : vector<30x128xf32> to vector<28x128xf32>
    %45 = arith.subf %43, %44 : vector<28x128xf32>
    %46 = vector.extract_strided_slice %17 {offsets = [4, 0], sizes = [24, 128], strides = [1, 1]} : vector<32x128xf32> to vector<24x128xf32>
    %c0_13 = arith.constant 0 : index
    %c0_14 = arith.constant 0 : index
    %c0_15 = arith.constant 0 : index
    %47 = vector.load %arg6[%c0_13, %c0_14, %c0_15] : memref<1x24x384xf32, #tpu.memory_space<vmem>>, vector<1x24x128xf32>
    %48 = vector.shape_cast %47 : vector<1x24x128xf32> to vector<24x128xf32>
    %49 = vector.shape_cast %46 : vector<24x128xf32> to vector<1x24x128xf32>
    tpu.vector_store %arg6[%c0_13, %c0_14, %c0_15], %49 {strides = array<i32>} : memref<1x24x384xf32, #tpu.memory_space<vmem>>, vector<1x24x128xf32>,
    %50 = vector.extract_strided_slice %42 {offsets = [3, 0], sizes = [24, 128], strides = [1, 1]} : vector<30x128xf32> to vector<24x128xf32>
    %c0_16 = arith.constant 0 : index
    %c0_17 = arith.constant 0 : index
    %c128 = arith.constant 128 : index
    %51 = vector.load %arg6[%c0_16, %c0_17, %c128] : memref<1x24x384xf32, #tpu.memory_space<vmem>>, vector<1x24x128xf32>
    %52 = vector.shape_cast %51 : vector<1x24x128xf32> to vector<24x128xf32>
    %53 = vector.shape_cast %50 : vector<24x128xf32> to vector<1x24x128xf32>
    tpu.vector_store %arg6[%c0_16, %c0_17, %c128], %53 {strides = array<i32>} : memref<1x24x384xf32, #tpu.memory_space<vmem>>, vector<1x24x128xf32>,
    %54 = vector.extract_strided_slice %45 {offsets = [2, 0], sizes = [24, 128], strides = [1, 1]} : vector<28x128xf32> to vector<24x128xf32>
    %c0_18 = arith.constant 0 : index
    %c0_19 = arith.constant 0 : index
    %c256 = arith.constant 256 : index
    %55 = vector.load %arg6[%c0_18, %c0_19, %c256] : memref<1x24x384xf32, #tpu.memory_space<vmem>>, vector<1x24x128xf32>
    %56 = vector.shape_cast %55 : vector<1x24x128xf32> to vector<24x128xf32>
    %57 = vector.shape_cast %54 : vector<24x128xf32> to vector<1x24x128xf32>
    tpu.vector_store %arg6[%c0_18, %c0_19, %c256], %57 {strides = array<i32>} : memref<1x24x384xf32, #tpu.memory_space<vmem>>, vector<1x24x128xf32>,
    return
  }
  func.func @transform_0(%arg0: i32, %arg1: i32) -> (i32, i32, i32, i32) {
    %c0_i32 = arith.constant 0 : i32
    %c0_i32_0 = arith.constant 0 : i32
    %c0_i32_1 = arith.constant 0 : i32
    return %arg0, %arg1, %c0_i32, %c0_i32_0 : i32, i32, i32, i32
  }
  func.func @transform_1(%arg0: i32, %arg1: i32) -> (i32, i32) {
    %c0_i32 = arith.constant 0 : i32
    %c0_i32_0 = arith.constant 0 : i32
    %c0_i32_1 = arith.constant 0 : i32
    return %c0_i32, %c0_i32_0 : i32, i32
  }
  func.func @transform_2(%arg0: i32, %arg1: i32) -> (i32, i32) {
    %c0_i32 = arith.constant 0 : i32
    %c0_i32_0 = arith.constant 0 : i32
    %c0_i32_1 = arith.constant 0 : i32
    return %c0_i32, %c0_i32_0 : i32, i32
  }
  func.func @transform_3(%arg0: i32, %arg1: i32) -> (i32, i32) {
    %c0_i32 = arith.constant 0 : i32
    %c0_i32_0 = arith.constant 0 : i32
    %c0_i32_1 = arith.constant 0 : i32
    return %c0_i32, %c0_i32_0 : i32, i32
  }
  func.func @transform_4(%arg0: i32, %arg1: i32) -> (i32, i32, i32) {
    %c0_i32 = arith.constant 0 : i32
    %c0_i32_0 = arith.constant 0 : i32
    return %arg0, %arg1, %c0_i32 : i32, i32, i32
  }
}

</mosaic_0001>

<bundles_post_ra>
// kernel: tpu_custom_call.1
= control target key start
LH: loop header
LB: loop body
LE: loop exit
PB: predicated region body
PF: predicated region fallthrough
CT: control target
= control target key end

     0   :  { %s1819_s0 = inlined_call_operand.hbm [shape: f32[2,1,32,32], index: 0, kind: input, shape index: {}]   ;;  %s1820_s1 = inlined_call_operand.hbm [shape: f32[32,256], index: 1, kind: input, shape index: {}]   ;;  %s1821_s2 = inlined_call_operand.hbm [shape: f32[128,128], index: 2, kind: input, shape index: {}]   ;;  %s1822_s3 = inlined_call_operand.hbm [shape: f32[128,128], index: 3, kind: input, shape index: {}]   ;;  %s1823_s4 = inlined_call_operand.hbm [shape: f32[2,24,384], index: 4, kind: output, shape index: {}]  }
   0x1   :  { %1828 = sst [smem:[#allocation15_spill]] %s1820_s1 }
   0x2   :  { %9 = vsyncpa [#allocation3], 0 }
   0x3   :  { %11 = vsyncpa [#allocation3 + $0x1], 0 }
   0x4   :  { %12 = vsyncpa [#allocation6], 0 }
   0x5   :  { %13 = vsyncpa [#allocation9], 0 }
   0x6   :  { %14 = vsyncpa [#allocation4], 0 }
   0x7   :  { %16 = vsyncpa [#allocation4 + $0x1], 0  ;;  %s1487_s15 = smov 0   ;;  %s1489_s16 = smov 0  }
   0x8   :  { %s1491_s17 = smov 0   ;;  %s1493_s18 = smov 0  }
   0x9   :  { %s1495_s19 = smov 0   ;;  %s1497_s20 = smov 0  }
   0xa LB: > { %s923_s21 = sadd.s32 4294967295, %s1448_s20   ;;  %s924_s22 = sadd.s32 4294967294, %s1448_s20   ;;  %s1448_s20 = sphi %s1497_s20, %s22_s20   ;;  %s1444_s19 = sphi %s1495_s19, %s1850_s19   ;;  %s1440_s18 = sphi %s1493_s18, %s1849_s18   ;;  %s1436_s17 = sphi %s1491_s17, %s1848_s17   ;;  %s1432_s16 = sphi %s1489_s16, %s1847_s16   ;;  %s1428_s15 = sphi %s1487_s15, %s1846_s15  }
   0xb   : > { %p56_p0 = scmp.ne.s32.totalorder %s1432_s16, %s1428_s15  ;;  %p1521_p1 = scmp.eq.s32.totalorder %s923_s21, 0 }
   0xc   : > { %p1525_p2 = scmp.eq.s32.totalorder %s923_s21, 1  ;;  %p151_p3 = scmp.eq.s32.totalorder %s924_s22, 1 }
   0xd   : > { %s1829_s23 = scalar_select %p1521_p1, 1, 0 }
   0xe   : > { %s1830_s24 = scalar_select %p1525_p2, 1, 0 }
   0xf   : > { %p1531_p4 = por %p1521_p1, %p56_p0  ;;  %p925_p5 = scmp.ge.s32.totalorder %s1448_s20, 1 }
  0x10   : > { %p1536_p6 = por %p151_p3, %p56_p0  ;;  %p158_p7 = scmp.lt.s32.totalorder %s1448_s20, 3 }
  0x11   : > { %s1831_s25 = scalar_select %p1531_p4, 1, 0 }
  0x12   : > { %s1832_s26 = scalar_select %p1536_p6, 1, 0 }
  0x13   : > { %p1541_p8 = pnand %p925_p5, %p158_p7  ;;  %s1450_s28 = smov [#allocation5]  }
  0x14   : > { %s170_s29 = sshll.u32 %s1450_s28, 4  ;;  %s1451_s5 = smov [#allocation7]   ;;  %s1545_s29 = int_to_ptr.vmem [resolvable:$true] %s170_s29 }
  0x15   : > { %s1833_s27 = scalar_select %p1541_p8, 1, 0 }
  0x16   : > { %p1152_p9 = pneg %p1541_p8  ;;  %s183_s6 = sshll.u32 %s1451_s5, 4  ;;  %s1556_s6 = int_to_ptr.vmem [resolvable:$true] %s183_s6 }
  0x17   : > { %s1835_s1 = sld [smem:[#allocation15_spill]] }
  0x18   : > { %p1552_p11 = pnand %p1152_p9, %p1521_p1 }
  0x1a   : > { %p1566_p13 = pneg %p1552_p11 }
  0x1d   : > { %s1244_s9 = scalar_lea.hbm %s1835_s1, 1024 }
  0x1e   : > { %p1245_p12 = scmp.ne.s32.totalorder %s1835_s1, %s1244_s9  ;;  %p1251_p5 = scmp.lt.u32.totalorder %s1244_s9, %s1835_s1 }
  0x20   : > { %p1247_p0 = pnand %p1566_p13, %p1245_p12 }
  0x22   : > { %p1248_p3 = pneg %p1247_p0 }
  0x24   : > { %p1253_p7 = pnand %p1251_p5, %p1248_p3 }
  0x26   : > { %1256 = shalt.err (!%p1253_p7)
}
  0x27   : > { %s1257_s21 = scalar_lea.vmem %s1545_s29, 1024  ;;  %p1265_p1 = scmp.lt.s32.totalorder %s1545_s29, %s1545_s29 }
  0x28   : > { %p1258_p9 = scmp.ne.s32.totalorder %s1545_s29, %s1257_s21  ;;  %p1266_p4 = scmp.lt.s32.totalorder %s1257_s21, %s1257_s21 }
  0x2a   : > { %p1260_p10 = pnand %p1258_p9, %p1566_p13  ;;  %p1267_p12 = por %p1266_p4, %p1265_p1 }
  0x2c   : > { %p1261_p6 = pneg %p1260_p10 }
  0x2e   : > { %p1268_p0 = pnand %p1267_p12, %p1261_p6 }
  0x30   : > { %1271 = shalt.err (!%p1268_p0)
}
  0x31   : > { %s1452_s22 = smov 256   ;;  %s1453_s28 = smov 16  }
  0x32   : > { %1155 = dma.hbm_to_vmem [thread:$0]  (!%p1552_p11), %s1835_s1, 1024, %s1545_s29, [#allocation6], %s1452_s22, %s1452_s22, %s1453_s28  }
  0x33   : > { %s1272_s10 = scalar_lea.hbm %s1821_s2, 2048 }
  0x34   : > { %p1273_p1 = scmp.ne.s32.totalorder %s1821_s2, %s1272_s10  ;;  %p1279_p10 = scmp.lt.u32.totalorder %s1272_s10, %s1821_s2 }
  0x36   : > { %p1275_p4 = pnand %p1273_p1, %p1566_p13 }
  0x38   : > { %p1276_p6 = pneg %p1275_p4 }
  0x3a   : > { %p1281_p3 = pnand %p1279_p10, %p1276_p6 }
  0x3c   : > { %1284 = shalt.err (!%p1281_p3)
}
  0x3d   : > { %s1285_s29 = scalar_lea.vmem %s1556_s6, 2048  ;;  %p1293_p12 = scmp.lt.s32.totalorder %s1556_s6, %s1556_s6 }
  0x3e   : > { %p1286_p5 = scmp.ne.s32.totalorder %s1556_s6, %s1285_s29  ;;  %p1294_p0 = scmp.lt.s32.totalorder %s1285_s29, %s1285_s29 }
  0x40   : > { %p1288_p7 = pnand %p1286_p5, %p1566_p13  ;;  %p1295_p1 = por %p1294_p0, %p1293_p12 }
  0x42   : > { %p1289_p9 = pneg %p1288_p7 }
  0x44   : > { %p1296_p4 = pnand %p1295_p1, %p1289_p9 }
  0x46   : > { %1299 = shalt.err (!%p1296_p4)
}
  0x47   : > { %s1454_s22 = smov 128   ;;  %s1455_s28 = smov 8  }
  0x48   : > { %1158 = dma.hbm_to_vmem [thread:$0]  (!%p1552_p11), %s1821_s2, 2048, %s1556_s6, [#allocation6], %s1454_s22, %s1454_s22, %s1455_s28  }
  0x49   : > { %s1456_s8 = smov [#allocation8]   ;;  %s1300_s13 = scalar_lea.hbm %s1822_s3, 2048 }
  0x4a   : > { %s196_s9 = sshll.u32 %s1456_s8, 4  ;;  %p1301_p6 = scmp.ne.s32.totalorder %s1822_s3, %s1300_s13  ;;  %s197_s9 = int_to_ptr.vmem [resolvable:$true] %s196_s9 }
  0x4b   : > { %p1307_p5 = scmp.lt.u32.totalorder %s1300_s13, %s1822_s3 }
  0x4c   : > { %p1303_p10 = pnand %p1301_p6, %p1566_p13 }
  0x4e   : > { %p1304_p3 = pneg %p1303_p10 }
  0x50   : > { %p1309_p7 = pnand %p1307_p5, %p1304_p3 }
  0x52   : > { %1312 = shalt.err (!%p1309_p7)
}
  0x53   : > { %s1313_s6 = scalar_lea.vmem %s197_s9, 2048  ;;  %p1321_p1 = scmp.lt.s32.totalorder %s197_s9, %s197_s9 }
  0x54   : > { %p1314_p9 = scmp.ne.s32.totalorder %s197_s9, %s1313_s6  ;;  %p1322_p4 = scmp.lt.s32.totalorder %s1313_s6, %s1313_s6 }
  0x56   : > { %p1316_p12 = pnand %p1314_p9, %p1566_p13  ;;  %p1323_p8 = por %p1322_p4, %p1321_p1 }
  0x58   : > { %p1317_p0 = pneg %p1316_p12 }
  0x5a   : > { %p1324_p2 = pnand %p1323_p8, %p1317_p0 }
  0x5c   : > { %1327 = shalt.err (!%p1324_p2)
}
  0x5d   : > { %1161 = dma.hbm_to_vmem [thread:$0]  (!%p1552_p11), %s1822_s3, 2048, %s197_s9, [#allocation9], %s1454_s22, %s1454_s22, %s1455_s28  }
  0x5e   : > { %s34_s12 = sadd.s32 1, %s1444_s19  ;;  %s43_s30 = sadd.s32 1, %s1436_s17 }
  0x5f   : > { %p36_p2 = scmp.ge.s32.totalorder %s34_s12, 2  ;;  %p50_p8 = scmp.ne.s32.totalorder %s1436_s17, %s1432_s16 }
  0x60   : > { %p51_p13 = scmp.eq.s32.totalorder %s1448_s20, 0  ;;  %p1838_p10 = scmp.ne.s32.totalorder %s1830_s24, 0 }
  0x61   : > { %s1852_s12 = smov (%p36_p2, %s34_s12), 0  ;;  %p1173_p11 = scmp.lt.s32.totalorder %s1448_s20, 2 }
  0x62   : > { %p1641_p6 = por %p51_p13, %p50_p8  ;;  %p1647_p3 = por %p1838_p10, %p50_p8 }
  0x63   : > { %s38_s10 = ssub.s32 %s1444_s19, %s1852_s12  ;;  %s210_s9 = sand.u32 1, %s1436_s17  }
  0x64   : > { %p41_p5 = scmp.eq.s32.totalorder %s38_s10, 0  ;;  %s930_s11 = sshll.u32 %s210_s9, 5 }
  0x65   : > { %s945_s14 = sshll.u32 %s1444_s19, 9  ;;  %s214_s24 = scalar_lea.vmem [#allocation2], %s930_s11 }
  0x66   : > { %s1656_s13 = scalar_select %p41_p5, %s1436_s17, %s43_s30  }
  0x67   : > { %s1662_s6 = scalar_lea.hbm %s1819_s0, %s945_s14  ;;  %s223_s1 = sshll.u32 %s214_s24, 4  ;;  %s1664_s1 = int_to_ptr.vmem [resolvable:$true] %s223_s1 }
  0x68   : > { %p1668_p7 = pnand %p1173_p11, %p1641_p6  ;;  %s1672_s30 = scalar_lea.sflag [#allocation3], %s210_s9 }
  0x69   : > { %s1328_s10 = scalar_lea.hbm %s1662_s6, 512  ;;  %s1333_s7 = scalar_lea.hbm %s1819_s0, 1024 }
  0x6a   : > { %p1329_p9 = scmp.ne.s32.totalorder %s1662_s6, %s1328_s10  ;;  %p1330_p12 = pneg %p1668_p7 }
  0x6b   : > { %p1334_p4 = scmp.lt.u32.totalorder %s1662_s6, %s1819_s0  ;;  %p1335_p2 = scmp.lt.u32.totalorder %s1333_s7, %s1328_s10 }
  0x6c   : > { %p1331_p0 = pnand %p1330_p12, %p1329_p9  ;;  %p1337_p13 = scmp.lt.u32.totalorder %s1328_s10, %s1662_s6 }
  0x6d   : > { %p1336_p8 = por %p1335_p2, %p1334_p4 }
  0x6e   : > { %p1332_p1 = pneg %p1331_p0 }
  0x6f   : > { %p1338_p6 = por %p1337_p13, %p1336_p8 }
  0x71   : > { %p1339_p10 = pnand %p1338_p6, %p1332_p1 }
  0x73   : > { %1342 = shalt.err (!%p1339_p10)
}
  0x74   : > { %s1343_s9 = scalar_lea.vmem %s1664_s1, 512  ;;  %s1457_s24 = smov [#allocation2]  }
  0x75   : > { %p1344_p11 = scmp.ne.s32.totalorder %s1664_s1, %s1343_s9  ;;  %s1348_s11 = sshll.u32 %s1457_s24, 4  ;;  %s1349_s11 = int_to_ptr.vmem [resolvable:$false] %s1348_s11 }
  0x76   : > { %s1350_s14 = scalar_lea.vmem %s1349_s11, 1024  ;;  %p1351_p0 = scmp.lt.s32.totalorder %s1664_s1, %s1349_s11 }
  0x77   : > { %p1346_p5 = pnand %p1344_p11, %p1330_p12  ;;  %p1352_p4 = scmp.lt.s32.totalorder %s1350_s14, %s1343_s9 }
  0x79   : > { %p1347_p9 = pneg %p1346_p5  ;;  %p1353_p2 = por %p1352_p4, %p1351_p0 }
  0x7b   : > { %p1354_p8 = pnand %p1353_p2, %p1347_p9 }
  0x7d   : > { %1357 = shalt.err (!%p1354_p8)
}
  0x7e   : > { %1165 = dma.hbm_to_vmem [thread:$0]  (!%p1668_p7), %s1662_s6, 512, %s1664_s1, %s1672_s30, %s1454_s22, %s1454_s22, %s1455_s28  }
  0x7f   : > { %p1841_p12 = scmp.ne.s32.totalorder %s1833_s27, 0 }
  0x80   : > { %s1706_s10 = sand.u32 (!%p1841_p12), 1, %s1432_s16   ;;  %p1842_p1 = scmp.ne.s32.totalorder (!%p1841_p12), %s1831_s25, 0 }
  0x81   : > { %235 = sbr.rel (%p1841_p12) target bundleno = 858 (0x35a), region = 36  ;;  %s934_s7 = sshll.u32 (!%p1841_p12), %s1706_s10, 5 }
  0x82   : > { %s238_s21 = scalar_lea.sflag (!%p1841_p12), [#allocation3], %s1706_s10  ;;  %s1710_s29 = scalar_lea.vmem (!%p1841_p12), [#allocation2], %s934_s7 }
  0x88   : > { %1411 = dma.done.wait (%p1842_p1), %s238_s21, 512  }
  0x89   : > { %1413 = vsyncadd (%p1842_p1), %s238_s21, 4294966784  ;;  %p1843_p7 = scmp.ne.s32.totalorder %s1829_s23, 0 }
  0x8b   : > { %1415 = dma.done.wait (%p1843_p7), [#allocation6], 3072  }
  0x8c   : > { %1417 = vsyncadd (%p1843_p7), [#allocation6], 4294964224 }
  0x8d   : > { %1419 = dma.done.wait (%p1843_p7), [#allocation9], 2048  }
  0x8e   : > { %1421 = vsyncadd (%p1843_p7), [#allocation9], 4294965248  ;;  %v1458_v0 = vmov 0.0   ;;  %v284_v1 = vld [vmem:[#allocation5 + $0x8] sm:$0xff]  ;;  %v286_v2 = vld [vmem:[#allocation5 + $0x18] sm:$0xff]  ;;  %vm291_vm0 = vcmask 261120  }
  0x8f   : > { %368 = vmatprep.mubr.f32.mxu0 %v1458_v0  ;;  %v283_v3 = vld [vmem:[#allocation5] sm:$0xff]  ;;  %v1062_v4 = vpack.c.bf16 %v286_v2, %v284_v1  ;;  %v285_v5 = vld [vmem:[#allocation5 + $0x10] sm:$0xff]  ;;  %v288_v6 = vld [vmem:[#allocation5 + $0x28] sm:$0xff]  ;;  %s1134_s23 = smul.u32 72, %s1706_s10  ;;  %vm623_vm1 = vcmask 1041408   ;;  %vm746_vm2 = vcmask 1043456  }
  0x90   : > { %v290_v7 = vld [vmem:[#allocation5 + $0x38] sm:$0xff]  ;;  %v1064_v8 = vpack.c.bf16 %v285_v5, %v283_v3  ;;  %v287_v10 = vld [vmem:[#allocation5 + $0x20] sm:$0xff]  ;;  %v289_v11 = vld [vmem:[#allocation5 + $0x30] sm:$0xff]  ;;  %vm655_vm3 = vcmask 1044480   ;;  %vm702_vm4 = vcmask 1045504   ;;  %vm672_vm6 = vcmask 1046528  }
  0x91   : > { %v1066_v9 = vpack.c.bf16 %v290_v7, %v288_v6  ;;  %1063 = vmatprep.subr.bf16.mxu0 %v1062_v4  ;;  %v1068_v12 = vpack.c.bf16 %v289_v11, %v287_v10  ;;  %v405_v13 = vld [vmem:[#allocation7] sm:$0xff]  ;;  %v406_v14 = vld [vmem:[#allocation7 + $0x8] sm:$0xff]  ;;  %v407_v15 = vld [vmem:[#allocation7 + $0x10] sm:$0xff]  ;;  %s1735_s25 = scalar_lea.vmem [#allocation10], %s1134_s23  ;;  %s1135_s27 = smul.u32 1152, %s1440_s18 }
  0x92   : > { %1065 = vmatpush1.bf16.msra.mxu0 %v1064_v8  ;;  %v1070_v16 = vpack.c.bf16 %v406_v14, %v405_v13  ;;  %v408_v17 = vld [vmem:[#allocation7 + $0x18] sm:$0xff]  ;;  %v409_v19 = vld [vmem:[#allocation7 + $0x20] sm:$0xff]  ;;  %v410_v20 = vld [vmem:[#allocation7 + $0x28] sm:$0xff]  ;;  %s807_s22 = sshll.u32 %s1735_s25, 4  ;;  %s791_s1 = scalar_lea.sflag [#allocation4], %s1706_s10  ;;  %s1764_s22 = int_to_ptr.vmem [resolvable:$true] %s807_s22 }
  0x93   : > { %1067 = vmatprep.subr.bf16.mxu0 %v1066_v9  ;;  %v1074_v18 = vpack.c.bf16 %v408_v17, %v407_v15  ;;  %v279_v21 = vld [vmem:[%s1710_s29] sm:$0xff]  ;;  %v1078_v22 = vpack.c.bf16 %v410_v20, %v409_v19  ;;  %v411_v23 = vld [vmem:[#allocation7 + $0x30] sm:$0xff]  ;;  %v412_v24 = vld [vmem:[#allocation7 + $0x38] sm:$0xff]  ;;  %s1762_s6 = scalar_lea.hbm %s1823_s4, %s1135_s27  ;;  %s1358_s5 = scalar_lea.vmem %s1764_s22, 1152 }
  0x94   : > { %1071 = vmatprep.subr.bf16.mxu1 %v1070_v16  ;;  %v280_v25 = vld [vmem:[%s1710_s29 + $0x8] sm:$0xff]  ;;  %v1082_v26 = vpack.c.bf16 %v412_v24, %v411_v23  ;;  %v413_v27 = vld [vmem:[#allocation7 + $0x40] sm:$0xff]  ;;  %v281_v29 = vld [vmem:[%s1710_s29 + $0x10] sm:$0xff]  ;;  %p1359_p13 = scmp.ne.s32.totalorder %s1764_s22, %s1358_s5  ;;  %s1459_s30 = smov [#allocation10]  }
  0x95   : > { %1073 = vmatpush3.bf16.msra.mxu1 %v1070_v16  ;;  %v414_v28 = vld [vmem:[#allocation7 + $0x48] sm:$0xff]  ;;  %v415_v31 = vld [vmem:[#allocation7 + $0x50] sm:$0xff]  ;;  %v416_v32 = vld [vmem:[#allocation7 + $0x58] sm:$0xff]  ;;  %s1362_s9 = sshll.u32 %s1459_s30, 4  ;;  %s1363_s9 = int_to_ptr.vmem [resolvable:$false] %s1362_s9 }
  0x96   : > { %1069 = vmatpush1.bf16.msra.mxu0 %v1068_v12  ;;  %1075 = vmatprep.subr.bf16.mxu1 %v1074_v18  ;;  %v1086_v30 = vpack.c.bf16 %v414_v28, %v413_v27  ;;  %v282_v33 = vld [vmem:[%s1710_s29 + $0x18] sm:$0xff]  ;;  %v1090_v34 = vpack.c.bf16 %v416_v32, %v415_v31  ;;  %v417_v35 = vld [vmem:[#allocation7 + $0x60] sm:$0xff]  ;;  %v418_v36 = vld [vmem:[#allocation7 + $0x68] sm:$0xff]  ;;  %p1360_p6 = pnand %p1359_p13, %p1647_p3  ;;  %s1364_s24 = scalar_lea.vmem %s1363_s9, 2304 }
  0x97   : > { %v1094_v37 = vpack.c.bf16 %v418_v36, %v417_v35  ;;  %v419_v38 = vld [vmem:[#allocation7 + $0x70] sm:$0xff]  ;;  %v420_v39 = vld [vmem:[#allocation7 + $0x78] sm:$0xff]  ;;  %v518_v41 = vld [vmem:[#allocation8] sm:$0xff]  ;;  %p1365_p11 = scmp.lt.s32.totalorder %s1764_s22, %s1363_s9  ;;  %p1366_p5 = scmp.lt.s32.totalorder %s1364_s24, %s1358_s5 }
  0x98   : > { %v1098_v40 = vpack.c.bf16 %v420_v39, %v419_v38  ;;  %v519_v42 = vld [vmem:[#allocation8 + $0x8] sm:$0xff]  ;;  %v520_v43 = vld [vmem:[#allocation8 + $0x10] sm:$0xff]  ;;  %v521_v45 = vld [vmem:[#allocation8 + $0x18] sm:$0xff]  ;;  %p1361_p10 = pneg %p1360_p6 }
  0x99   : > { %938 = vmatmul.mubr.msk.f32.vlgmr.msra.gmra.mrb[0].mxu0 %vm291_vm0, %v279_v21  ;;  %1077 = vmatpush3.bf16.msra.mxu1 %v1074_v18  ;;  %v1102_v44 = vpack.c.bf16 %v519_v42, %v518_v41  ;;  %v1106_v46 = vpack.c.bf16 %v521_v45, %v520_v43  ;;  %v522_v47 = vld [vmem:[#allocation8 + $0x20] sm:$0xff]  ;;  %v523_v48 = vld [vmem:[#allocation8 + $0x28] sm:$0xff]  ;;  %v524_v6 = vld [vmem:[#allocation8 + $0x30] sm:$0xff]  ;;  %v639_v41 = vlaneseq  ;;  %p1367_p9 = por %p1366_p5, %p1365_p11 }
  0x9a   : > { %374 = vmatprep.mubr.f32.mxu0 %v1458_v0  ;;  %1079 = vmatprep.subr.bf16.mxu1 %v1078_v22  ;;  %v1110_v49 = vpack.c.bf16 %v523_v48, %v522_v47  ;;  %v525_v7 = vld [vmem:[#allocation8 + $0x38] sm:$0xff]  ;;  %v526_v9 = vld [vmem:[#allocation8 + $0x40] sm:$0xff]  ;;  %v527_v10 = vld [vmem:[#allocation8 + $0x48] sm:$0xff] }
  0x9b   : > { %1103 = vmatprep.subr.bf16.mxu0 %v1102_v44  ;;  %v1114_v8 = vpack.c.bf16 %v525_v7, %v524_v6  ;;  %v1118_v11 = vpack.c.bf16 %v527_v10, %v526_v9  ;;  %v528_v12 = vld [vmem:[#allocation8 + $0x50] sm:$0xff]  ;;  %v529_v13 = vld [vmem:[#allocation8 + $0x58] sm:$0xff]  ;;  %v530_v15 = vld [vmem:[#allocation8 + $0x60] sm:$0xff]  ;;  %v640_v42 = vshrl.u32 %v639_v41, 7  ;;  %p1368_p0 = pnand %p1367_p9, %p1361_p10 }
  0x9c   : > { %1105 = vmatpush3.bf16.msra.mxu0 %v1102_v44  ;;  %v1122_v14 = vpack.c.bf16 %v529_v13, %v528_v12  ;;  %v531_v16 = vld [vmem:[#allocation8 + $0x68] sm:$0xff]  ;;  %v532_v18 = vld [vmem:[#allocation8 + $0x70] sm:$0xff]  ;;  %v533_v19 = vld [vmem:[#allocation8 + $0x78] sm:$0xff] }
  0x9d   : > { %939 = vmatmul.mubr.msk.f32.gmra.mrb[2].mxu0 %vm291_vm0, %v280_v25  ;;  %1081 = vmatpush3.bf16.msra.mxu1 %v1078_v22  ;;  %v1126_v17 = vpack.c.bf16 %v531_v16, %v530_v15  ;;  %v1130_v20 = vpack.c.bf16 %v533_v19, %v532_v18 }
  0x9e   : > { %380 = vmatprep.mubr.f32.mxu0 %v1458_v0  ;;  %1083 = vmatprep.subr.bf16.mxu1 %v1082_v26 }
  0x9f   : > { %1107 = vmatprep.subr.bf16.mxu0 %v1106_v46 }
  0xa0   : > { %1109 = vmatpush3.bf16.msra.mxu0 %v1106_v46 }
  0xa1   : > { %940 = vmatmul.mubr.msk.f32.gmra.mrb[4].mxu0 %vm291_vm0, %v281_v29  ;;  %1085 = vmatpush3.bf16.msra.mxu1 %v1082_v26 }
  0xa2   : > { %386 = vmatprep.mubr.f32.mxu0 %v1458_v0  ;;  %1087 = vmatprep.subr.bf16.mxu1 %v1086_v30 }
  0xa3   : > { %1111 = vmatprep.subr.bf16.mxu0 %v1110_v49 }
  0xa4   : > { %1113 = vmatpush3.bf16.msra.mxu0 %v1110_v49  ;;  %v647_v49 = vadd.s32 4294967293, %v640_v42 }
  0xa5   : > { %941 = vmatmul.mubr.msk.f32.gmra.mrb[6].mxu0 %vm291_vm0, %v282_v33  ;;  %1089 = vmatpush3.bf16.msra.mxu1 %v1086_v30 }
  0xa6   : > { %1091 = vmatprep.subr.bf16.mxu1 %v1090_v34  ;;  %1115 = vmatprep.subr.bf16.mxu0 %v1114_v8  ;;  %vm686_vm5 = vcmp.eq.s32.totalorder %v647_v49, 4294967295 }
  0xa8   : > { %1117 = vmatpush3.bf16.msra.mxu0 %v1114_v8 }
  0xa9   : > { %1093 = vmatpush3.bf16.msra.mxu1 %v1090_v34  ;;  %1119 = vmatprep.subr.bf16.mxu0 %v1118_v11 }
  0xaa   : > { %1095 = vmatprep.subr.bf16.mxu1 %v1094_v37 }
  0xac   : > { %1121 = vmatpush3.bf16.msra.mxu0 %v1118_v11 }
  0xad   : > { %1097 = vmatpush3.bf16.msra.mxu1 %v1094_v37  ;;  %1123 = vmatprep.subr.bf16.mxu0 %v1122_v14 }
  0xae   : > { %1099 = vmatprep.subr.bf16.mxu1 %v1098_v40 }
  0xb0   : > { %1125 = vmatpush3.bf16.msra.mxu0 %v1122_v14 }
  0xb1   : > { %1101 = vmatpush3.bf16.msra.mxu1 %v1098_v40  ;;  %1127 = vmatprep.subr.bf16.mxu0 %v1126_v17 }
  0xb4   : > { %1129 = vmatpush3.bf16.msra.mxu0 %v1126_v17 }
  0xb5   : > { %1131 = vmatprep.subr.bf16.mxu0 %v1130_v20 }
  0xb8   : > { %1133 = vmatpush3.bf16.msra.mxu0 %v1130_v20 }
 0x16c   : > { %v370_v50 = vpop.f32.mrb[0].mxu0 }
 0x16d   : > { %v393_v51 = vmul.f32 %v370_v50, %v370_v50  ;;  %v372_v52 = vpop.f32.mrb[1].mxu0 }
 0x16e   : > { %v397_v53 = vmul.f32 %v372_v52, %v372_v52 }
 0x170   : > { %v376_v54 = vpop.f32.mrb[2].mxu0  ;;  %v401_v55 = vadd.f32 %v397_v53, %v393_v51 }
 0x171   : > { %v394_v56 = vmul.f32 %v376_v54, %v376_v54  ;;  %v378_v57 = vpop.f32.mrb[3].mxu0 }
 0x172   : > { %v398_v58 = vmul.f32 %v378_v57, %v378_v57  ;;  %1018 = vmatprep.mubr.f32.mxu1 %v401_v55 }
 0x174   : > { %v402_v59 = vadd.f32 %v398_v58, %v394_v56  ;;  %v382_v60 = vpop.f32.mrb[4].mxu0  ;;  %v642_v58 = vadd.s32 16, %v640_v42 }
 0x175   : > { %v395_v61 = vmul.f32 %v382_v60, %v382_v60  ;;  %v384_v62 = vpop.f32.mrb[5].mxu0 }
 0x176   : > { %v399_v63 = vmul.f32 %v384_v62, %v384_v62  ;;  %1019 = vmatmul.mubr.f32.vlgmr.msra.gmra.mrb[0].mxu1 %v402_v59 }
 0x178   : > { %v403_v0 = vadd.f32 %v399_v63, %v395_v61  ;;  %v388_v1 = vpop.f32.mrb[6].mxu0 }
 0x179   : > { %v396_v2 = vmul.f32 %v388_v1, %v388_v1  ;;  %v390_v3 = vpop.f32.mrb[7].mxu0 }
 0x17a   : > { %v400_v4 = vmul.f32 %v390_v3, %v390_v3  ;;  %1021 = vmatprep.mubr.f32.mxu1 %v403_v0 }
 0x17c   : > { %v404_v5 = vadd.f32 %v400_v4, %v396_v2  ;;  %v649_v4 = vadd.s32 4294967293, %v642_v58 }
 0x17e   : > { %1022 = vmatmul.mubr.f32.gmra.mrb[2].mxu1 %v404_v5  ;;  %vm692_vm7 = vcmp.eq.s32.totalorder %v649_v4, 17 }
 0x249   : > { %v1020_v21 = vpop.f32.mrb[0].mxu1 }
 0x24a   : > { %v493_v22 = vadd.f32 1.1920929e-07, %v1020_v21  ;;  %v487_v23 = vpop.f32.mrb[1].mxu1 }
 0x24b   : > { %v488_v24 = vadd.f32 1.1920929e-07, %v487_v23 }
 0x24c   : > { %1236 = vlog2.f32 %v493_v22 }
 0x24d   : > { %1238 = vlog2.f32 %v488_v24 }
 0x251   : > { %v1023_v25 = vpop.f32.mrb[2].mxu1 }
 0x252   : > { %v503_v26 = vadd.f32 1.1920929e-07, %v1023_v25  ;;  %v497_v27 = vpop.f32.mrb[3].mxu1 }
 0x253   : > { %v498_v28 = vadd.f32 1.1920929e-07, %v497_v27 }
 0x254   : > { %1240 = vlog2.f32 %v503_v26 }
 0x255   : > { %1242 = vlog2.f32 %v498_v28 }
 0x256   : > { %v1237_v29 = vpop.eup %1236 }
 0x257   : > { %v1239_v30 = vpop.eup %1238  ;;  %v509_v31 = vmul.f32 0.6931472, %v1237_v29 }
 0x258   : > { %v507_v32 = vmul.f32 0.6931472, %v1239_v30 }
 0x259   : > { %v515_v34 = vmul.f32 0.4342945, %v509_v31 }
 0x25a   : > { %v514_v33 = vmul.f32 0.4342945, %v507_v32 }
 0x25c   : > { %1056 = vmatprep.mubr.f32.mxu0 %v514_v33 }
 0x25d   : > { %1057 = vmatmul.mubr.f32.vlgmr.msra.gmra.mrb[8].mxu0 %v515_v34 }
 0x25e   : > { %v1241_v35 = vpop.eup %1240 }
 0x25f   : > { %v1243_v36 = vpop.eup %1242  ;;  %v513_v37 = vmul.f32 0.6931472, %v1241_v35 }
 0x260   : > { %v511_v38 = vmul.f32 0.6931472, %v1243_v36 }
 0x261   : > { %v517_v40 = vmul.f32 0.4342945, %v513_v37 }
 0x262   : > { %v516_v39 = vmul.f32 0.4342945, %v511_v38 }
 0x264   : > { %1059 = vmatprep.mubr.f32.mxu0 %v516_v39 }
 0x265   : > { %1060 = vmatmul.mubr.f32.gmra.mrb[10].mxu0 %v517_v40 }
 0x330   : > { %v1058_v43 = vpop.f32.mrb[8].mxu0 }
 0x331   : > { %v625_v44 = vrot.slane %v1058_v43, 6  ;;  %v748_v45 = vrot.slane %v1058_v43, 4  ;;  %v600_v46 = vpop.f32.mrb[9].mxu0 }
 0x332   : > { %v624_v47 = vrot.slane %v600_v46, 6  ;;  %v747_v48 = vrot.slane %v600_v46, 4 }
 0x334   : > { %v626_v50 = vsel %vm623_vm1, %v624_v47, %v625_v44  ;;  %v635_v51 = vsub.f32 %v600_v46, %v624_v47  ;;  %v749_v52 = vsel %vm746_vm2, %v747_v48, %v748_v45 }
 0x335   : > { %v636_v53 = vsub.f32 %v1058_v43, %v626_v50  ;;  %757 = vst [vmem:[%s1735_s25] sm:$0xff] %v749_v52 }
 0x336   : > { %v656_v54 = vrot.slane %v635_v51, 3  ;;  %v670_v55 = vrot.slane %v635_v51, 2 }
 0x337   : > { %v657_v56 = vrot.slane %v636_v53, 3  ;;  %v703_v57 = vrot.slane %v636_v53, 2 }
 0x338   : > { %v1061_v59 = vpop.f32.mrb[10].mxu0 }
 0x339   : > { %v658_v60 = vsel %vm655_vm3, %v656_v54, %v657_v56  ;;  %v704_v61 = vsel %vm702_vm4, %v670_v55, %v703_v57  ;;  %v629_v62 = vrot.slane %v1061_v59, 6  ;;  %v752_v63 = vrot.slane %v1061_v59, 4  ;;  %v610_v0 = vpop.f32.mrb[11].mxu0 }
 0x33a   : > { %v723_v1 = vsel %vm686_vm5, %v658_v60, %v704_v61  ;;  %v627_v2 = vrot.slane %v610_v0, 6  ;;  %v750_v3 = vrot.slane %v610_v0, 4 }
 0x33b   : > { %v731_v14 = vrot.slane %v723_v1, 6  ;;  %v760_v19 = vrot.slane %v723_v1, 3 }
 0x33c   : > { %v628_v5 = vsel %vm623_vm1, %v625_v44, %v627_v2  ;;  %v630_v6 = vsel %vm623_vm1, %v627_v2, %v629_v62  ;;  %v751_v7 = vsel %vm746_vm2, %v748_v45, %v750_v3  ;;  %v753_v8 = vsel %vm746_vm2, %v750_v3, %v752_v63 }
 0x33d   : > { %v637_v9 = vsub.f32 %v610_v0, %v628_v5  ;;  %v638_v10 = vsub.f32 %v1061_v59, %v630_v6  ;;  %758 = vst [vmem:[%s1735_s25 + $0x18] sm:$0xff] %v751_v7  ;;  %759 = vst [vmem:[%s1735_s25 + $0x30] sm:$0xff] %v753_v8  ;;  %v742_v23 = vsub.f32 %v723_v1, %v731_v14 }
 0x33f   : > { %v667_v11 = vrot.slane %v638_v10, 2  ;;  %v676_v12 = vrot.slane %v637_v9, 1  ;;  %v678_v13 = vrot.slane %v638_v10, 1  ;;  %v705_v15 = vrot.slane %v637_v9, 2 }
 0x340   : > { %v777_v37 = vrot.slane %v742_v23, 4 }
 0x341   : > { %v679_v16 = vsel %vm672_vm6, %v676_v12, %v678_v13  ;;  %v706_v17 = vsel %vm702_vm4, %v703_v57, %v705_v15  ;;  %v707_v18 = vsel %vm702_vm4, %v705_v15, %v667_v11  ;;  %v736_v25 = vrot.slane %v667_v11, 6 }
 0x342   : > { %v713_v20 = vsel %vm692_vm7, %v679_v16, %v707_v18  ;;  %v732_v21 = vrot.slane %v706_v17, 6  ;;  %v761_v22 = vrot.slane %v706_v17, 3  ;;  %v765_v29 = vrot.slane %v667_v11, 3 }
 0x343   : > { %v734_v24 = vrot.slane %v713_v20, 6  ;;  %v763_v26 = vrot.slane %v713_v20, 3 }
 0x344   : > { %v733_v27 = vsel %vm623_vm1, %v731_v14, %v732_v21  ;;  %v762_v28 = vsel %vm655_vm3, %v760_v19, %v761_v22 }
 0x345   : > { %v735_v30 = vsel %vm623_vm1, %v732_v21, %v734_v24  ;;  %v737_v31 = vsel %vm623_vm1, %v734_v24, %v736_v25  ;;  %v743_v32 = vsub.f32 %v706_v17, %v733_v27  ;;  %v764_v33 = vsel %vm655_vm3, %v761_v22, %v763_v26  ;;  %770 = vst [vmem:[%s1735_s25 + $0x8] sm:$0xff] %v762_v28 }
 0x346   : > { %v744_v34 = vsub.f32 %v713_v20, %v735_v30  ;;  %v745_v35 = vsub.f32 %v667_v11, %v737_v31  ;;  %v766_v36 = vsel %vm655_vm3, %v763_v26, %v765_v29  ;;  %771 = vst [vmem:[%s1735_s25 + $0x20] sm:$0xff] %v764_v33 }
 0x347   : > { %772 = vst [vmem:[%s1735_s25 + $0x38] sm:$0xff] %v766_v36  ;;  %v778_v38 = vrot.slane %v743_v32, 4 }
 0x348   : > { %v780_v39 = vrot.slane %v744_v34, 4  ;;  %v782_v40 = vrot.slane %v745_v35, 4 }
 0x349   : > { %v779_v41 = vsel %vm746_vm2, %v777_v37, %v778_v38 }
 0x34a   : > { %v781_v42 = vsel %vm746_vm2, %v778_v38, %v780_v39  ;;  %v783_v43 = vsel %vm746_vm2, %v780_v39, %v782_v40  ;;  %787 = vst [vmem:[%s1735_s25 + $0x10] sm:$0xff] %v779_v41 }
 0x34b   : > { %788 = vst [vmem:[%s1735_s25 + $0x28] sm:$0xff] %v781_v42  ;;  %789 = vst [vmem:[%s1735_s25 + $0x40] sm:$0xff] %v783_v43 }
 0x34c   : > { %1371 = shalt.err (!%p1368_p0)
}
 0x34d   : > { %s1372_s11 = scalar_lea.hbm %s1762_s6, 1152  ;;  %s1376_s21 = scalar_lea.hbm %s1823_s4, 2304 }
 0x34e   : > { %p1373_p4 = scmp.ne.s32.totalorder %s1762_s6, %s1372_s11  ;;  %p1377_p12 = scmp.lt.u32.totalorder %s1762_s6, %s1823_s4 }
 0x34f   : > { %p1378_p1 = scmp.lt.u32.totalorder %s1376_s21, %s1372_s11  ;;  %p1380_p13 = scmp.lt.u32.totalorder %s1372_s11, %s1762_s6 }
 0x350   : > { %p1374_p2 = pnand %p1373_p4, %p1647_p3 }
 0x351   : > { %p1379_p7 = por %p1378_p1, %p1377_p12 }
 0x352   : > { %p1375_p8 = pneg %p1374_p2 }
 0x353   : > { %p1381_p6 = por %p1380_p13, %p1379_p7 }
 0x355   : > { %p1382_p10 = pnand %p1381_p6, %p1375_p8 }
 0x357   : > { %1385 = shalt.err (!%p1382_p10)
}
 0x358   : > { %s1460_s25 = smov 384   ;;  %s1461_s27 = smov 24  }
 0x359   : > { %1150 = dma.vmem_to_hbm [thread:$0]  (%p1647_p3), %s1764_s22, 1152, %s1762_s6, %s791_s1, %s1460_s25, %s1460_s25, %s1461_s27  }
 0x35a PF: > { %s822_s18 = sand.u32 1, %s1428_s15   ;;  %p1844_p11 = scmp.ne.s32.totalorder %s1832_s26, 0 }
 0x35b   : > { %p1845_p5 = scmp.ge.s32.totalorder %s1448_s20, 2  ;;  %s823_s28 = scalar_lea.sflag [#allocation4], %s822_s18 }
 0x35d   : > { %p1167_p9 = pnand %p1845_p5, %p1844_p11 }
 0x35f   : > { %1423 = dma.done.wait (!%p1167_p9), %s823_s28, 1152  }
 0x360   : > { %1425 = vsyncadd (!%p1167_p9), %s823_s28, 4294966144  ;;  %s22_s20 = sadd.s32 1, %s1448_s20   ;;  %s1846_s15 = smov %s1432_s16 }
 0x361   : > { %p19_p0 = scmp.ge.s32.totalorder %s22_s20, 4   ;;  %s1847_s16 = smov %s1436_s17 }
 0x362   : > { %s1848_s17 = smov %s1656_s13  ;;  %s1849_s18 = smov %s1444_s19 }
 0x363   : > { %s1850_s19 = smov %s1852_s12  ;;  %21 = sbr.rel (!%p19_p0) target bundleno = 10 (0xa), region = 93 }
 0x36a   :  { %828 = vsyncpa [#allocation3], 1 }
 0x36b   :  { %830 = vsyncpa [#allocation3 + $0x1], 1 }
 0x36c   :  { %831 = vsyncpa [#allocation6], 1 }
 0x36d   :  { %832 = vsyncpa [#allocation9], 1 }
 0x36e   :  { %833 = vsyncpa [#allocation4], 1 }
 0x36f   :  { %835 = vsyncpa [#allocation4 + $0x1], 1 }

</bundles_post_ra>
